<compile_context>
chip_gen: v7x
topology: tpu7x:2x2x1
jax: 0.10.0
libtpu: 0.0.40
codegen_flags: <defaults>
</compile_context>

<pallas_src>
import functools
import math

import jax
import jax.numpy as jnp
from jax.experimental import pallas as pl
from jax.experimental.pallas import tpu as pltpu

_LN10 = math.log(10.0)


def _damping_kernel(const_ref, out_ref, *, a2: float, b2: float):
    # lambda = 10 ** (log_min + sigmoid(x) * (log_max - log_min))
    #        = exp(a2 + b2 * tanh(0.5 * x))   with a2, b2 folded at trace time.
    x = const_ref[...].astype(jnp.float32)
    t = jnp.tanh(jnp.float32(0.5) * x)                       # EUP
    out_ref[...] = jnp.exp(jnp.float32(a2) + jnp.float32(b2) * t).astype(out_ref.dtype)


def damping_net_forward(const: jax.Array, log_range=(-6.0, 5.0)) -> jax.Array:
    """Pallas implementation of DampingNet.forward().

    Args:
      const: (num_params,) float32 parameter vector (the nn.Parameter).
      log_range: (min, max) python scalars, as in conf.log_range (static).

    Returns:
      lambda_: (num_params,) float32.
    """
    log_min, log_max = float(log_range[0]), float(log_range[1])
    half_span = 0.5 * (log_max - log_min)
    a2 = (log_min + half_span) * _LN10
    b2 = half_span * _LN10

    num_params = const.shape[0]
    # Lane-major presentation: parameter axis on the 128-lane dimension.
    const_2d = const.astype(jnp.float32).reshape(1, num_params)

    kernel = functools.partial(_damping_kernel, a2=a2, b2=b2)

    # Gridless whole-array call: no pipelining/prefetch machinery, single
    # invocation on one (partial) vreg resident in VMEM.
    out_2d = pl.pallas_call(
        kernel,
        out_shape=jax.ShapeDtypeStruct((1, num_params), jnp.float32),
        in_specs=[pl.BlockSpec(memory_space=pltpu.VMEM)],
        out_specs=pl.BlockSpec(memory_space=pltpu.VMEM),
    )(const_2d)
    return out_2d.reshape(num_params)


# Jitted entry point: under jit the reshape/astype presentation ops fold into
# the surrounding program instead of being separately dispatched XLA ops.
damping_net_forward_jit = jax.jit(damping_net_forward, static_argnames="log_range")


def damping_net_ref(const: jax.Array, log_range=(-6.0, 5.0)) -> jax.Array:
    """Pure-JAX reference matching the PyTorch forward."""
    min_, max_ = log_range
    return 10.0 ** (min_ + jax.nn.sigmoid(const) * (max_ - min_))


if __name__ == "__main__":
    num_params = 6
    log_range = (-6.0, 5.0)

    # Deterministic parameter init. (PyTorch inits `const` to zeros; use small
    # random values here so the elementwise path is non-trivial.)
    key = jax.random.PRNGKey(0)
    const = jax.random.normal(key, (num_params,), dtype=jnp.float32)

    lam = damping_net_forward_jit(const, log_range=log_range)
    lam = jax.block_until_ready(lam)

    lam_ref = damping_net_ref(const, log_range)
    assert lam.shape == (num_params,)
    assert jnp.allclose(lam, lam_ref, rtol=1e-5, atol=1e-5), (lam, lam_ref)

    # Also check the zero-init (PyTorch default) and saturation limits.
    lam0 = jax.block_until_ready(damping_net_forward_jit(jnp.zeros((num_params,), jnp.float32),
                                                         log_range=log_range))
    assert jnp.allclose(lam0, damping_net_ref(jnp.zeros((num_params,))), rtol=1e-5, atol=1e-5)

    print("KERNEL_OK")
</pallas_src>

<mosaic_0001>
module attributes {stable_mosaic.version = 11 : i64} {
  func.func @_damping_kernel(%arg0: memref<1x6xf32, #tpu.memory_space<vmem>>, %arg1: memref<1x6xf32, #tpu.memory_space<vmem>>) attributes {dimension_semantics = [], scalar_prefetch = 0 : i64, scratch_operands = 0 : i64, tpu.core_type = #tpu.core_type<tc>} {
    %c0 = arith.constant 0 : index
    %c0_0 = arith.constant 0 : index
    %0 = vector.load %arg0[%c0, %c0_0] : memref<1x6xf32, #tpu.memory_space<vmem>>, vector<1x6xf32>
    %cst = arith.constant 5.000000e-01 : f32
    %1 = vector.broadcast %cst : f32 to vector<1x6xf32>
    %2 = arith.mulf %1, %0 : vector<1x6xf32>
    %3 = math.tanh %2 : vector<1x6xf32>
    %cst_1 = arith.constant 12.6642179 : f32
    %4 = vector.broadcast %cst_1 : f32 to vector<1x6xf32>
    %5 = arith.mulf %4, %3 : vector<1x6xf32>
    %cst_2 = arith.constant -1.15129256 : f32
    %6 = vector.broadcast %cst_2 : f32 to vector<1x6xf32>
    %7 = arith.addf %6, %5 : vector<1x6xf32>
    %8 = math.exp %7 : vector<1x6xf32>
    %c0_3 = arith.constant 0 : index
    %c0_4 = arith.constant 0 : index
    %9 = vector.load %arg1[%c0_3, %c0_4] : memref<1x6xf32, #tpu.memory_space<vmem>>, vector<1x6xf32>
    tpu.vector_store %arg1[%c0_3, %c0_4], %8 {strides = array<i32>} : memref<1x6xf32, #tpu.memory_space<vmem>>, vector<1x6xf32>,
    return
  }
}

</mosaic_0001>

<bundles_post_ra>
// kernel: damping_net_forward.1
= control target key start
LH: loop header
LB: loop body
LE: loop exit
PB: predicated region body
PF: predicated region fallthrough
CT: control target
= control target key end

     0   :  { %s87_s0 = inlined_call_operand.vmem [shape: f32[1,6], index: 0, kind: input, shape index: {}]   ;;  %s88_s1 = inlined_call_operand.hbm [shape: f32[1,6], index: 1, kind: output, shape index: {}]  }
   0x1   :  { %v9_v0 = vld [vmem:[%s87_s0] sm:$0x1] }
   0x2   :  { %6 = vsyncpa [#allocation3], 0  ;;  %v10_v1 = vmul.f32 0.5, %v9_v0  ;;  %s61_s8 = smov [#allocation2]   ;;  %vm16_vm0 = vcmask 40960  }
   0x3   :  { %s24_s9 = sshll.u32 %s61_s8, 4  ;;  %s25_s9 = int_to_ptr.vmem [resolvable:$true] %s24_s9 }
   0x4   :  { %33 = vtanh.f32 %v10_v1  ;;  %s37_s10 = scalar_lea.vmem %s25_s9, 16  ;;  %s41_s11 = scalar_lea.vmem %s25_s9, 32 }
   0x5   :  { %p38_p0 = scmp.ne.s32.totalorder %s25_s9, %s37_s10  ;;  %p42_p1 = scmp.lt.s32.totalorder %s25_s9, %s25_s9 }
   0x6   :  { %p43_p2 = scmp.lt.s32.totalorder %s41_s11, %s37_s10 }
   0x8   :  { %p44_p3 = por %p43_p2, %p42_p1 }
   0xa   :  { %p45_p4 = pnand %p44_p3, %p38_p0 }
   0xe   :  { %v34_v2 = vpop.eup %33 }
   0xf   :  { %v12_v3 = vmul.f32 12.664218, %v34_v2 }
  0x11   :  { %v13_v4 = vadd.f32 -1.1512926, %v12_v3 }
  0x13   :  { %v14_v5 = vmul.f32 1.442695, %v13_v4 }
  0x15   :  { %35 = vpow2.f32 %v14_v5 }
  0x1f   :  { %v36_v6 = vpop.eup %35 }
  0x20   :  { %17 = vst.msk [vmem:[#allocation2] sm:$0x1] %vm16_vm0, %v36_v6 }
  0x21   :  { %48 = shalt.err (!%p45_p4)
}
  0x22   :  { %s49_s13 = scalar_lea.hbm %s88_s1, 16 }
  0x23   :  { %p50_p5 = scmp.ne.s32.totalorder %s88_s1, %s49_s13  ;;  %p53_p6 = scmp.lt.u32.totalorder %s49_s13, %s88_s1 }
  0x25   :  { %p55_p7 = pnand %p53_p6, %p50_p5 }
  0x27   :  { %58 = shalt.err (!%p55_p7)
}
  0x28   :  { %27 = dma.vmem_to_hbm [thread:$0]  %s25_s9, 16, %s88_s1, [#allocation3]  }
  0x29   :  { %59 = dma.done.wait [#allocation3], 16  }
  0x2a   :  { %60 = vsyncadd [#allocation3], 4294967280 }
  0x2b   :  { %31 = vsyncpa [#allocation3], 1 }

</bundles_post_ra>
